<compile_context>
chip_gen: v5e
topology: v5e:2x2
jax: 0.10.0
libtpu: 0.0.40
codegen_flags: <defaults>
</compile_context>

<pallas_src>
import functools

import jax
import jax.numpy as jnp
from jax.experimental import pallas as pl
from jax.experimental.pallas import tpu as pltpu

IN_FEATURES = 12
HIDDEN = 256
OUT_FEATURES = 3

K_PAD = 128       # padded input-feature dim (lane-dense contraction for layer 1)
N_PAD = 128       # padded output-feature dim (lane-dense stores for layer 3)
MAX_TILE_B = 128  # max batch rows per grid step (multiple of 8)


def _mlp_kernel(x_ref, w1_ref, b1_ref, w2_ref, b2_ref, w3_ref, b3_ref, o_ref):
    # layer 1 + ReLU (MXU matmul, f32 accumulate; bias add / ReLU on the VPU)
    h1 = jnp.dot(x_ref[...], w1_ref[...], preferred_element_type=jnp.float32)
    h1 = jnp.maximum(h1 + b1_ref[...].astype(jnp.float32), 0.0)
    # layer 2 + ReLU
    h2 = jnp.dot(h1.astype(w2_ref.dtype), w2_ref[...],
                 preferred_element_type=jnp.float32)
    h2 = jnp.maximum(h2 + b2_ref[...].astype(jnp.float32), 0.0)
    # layer 3 (no activation), lane-dense (tile_b, 128) unmasked store
    out = jnp.dot(h2.astype(w3_ref.dtype), w3_ref[...],
                  preferred_element_type=jnp.float32)
    o_ref[...] = (out + b3_ref[...].astype(jnp.float32)).astype(o_ref.dtype)


@jax.jit
def my_model_forward(x, params):
    """x: [B, 12] float32.  params: padded kernel-layout dict from prepare_params."""
    w1, b1, w2, b2, w3, b3 = (
        params["w1"], params["b1"], params["w2"],
        params["b2"], params["w3"], params["b3"],
    )
    B = x.shape[0]
    # Batch tile: multiple of 8 (sublane), capped at 128 (MXU-friendly).
    tile_b = min(MAX_TILE_B, pl.cdiv(B, 8) * 8)
    b_pad = pl.cdiv(B, tile_b) * tile_b

    # Zero-pad batch to a tile multiple and features 12 -> 128 (lane-dense K).
    x_p = jnp.pad(x, ((0, b_pad - B), (0, K_PAD - IN_FEATURES))).astype(w1.dtype)

    grid = (b_pad // tile_b,)
    const = lambda i: (0, 0)   # weights/biases: same block every step -> VMEM-resident

    out_padded = pl.pallas_call(
        _mlp_kernel,
        out_shape=jax.ShapeDtypeStruct((b_pad, N_PAD), jnp.float32),
        grid=grid,
        in_specs=[
            pl.BlockSpec((tile_b, K_PAD), lambda i: (i, 0)),   # x: tiled over batch
            pl.BlockSpec((K_PAD, HIDDEN), const),              # w1 (K zero-padded)
            pl.BlockSpec((1, HIDDEN), const),                  # b1
            pl.BlockSpec((HIDDEN, HIDDEN), const),             # w2
            pl.BlockSpec((1, HIDDEN), const),                  # b2
            pl.BlockSpec((HIDDEN, N_PAD), const),              # w3 (N zero-padded)
            pl.BlockSpec((1, N_PAD), const),                   # b3 (N zero-padded)
        ],
        out_specs=pl.BlockSpec((tile_b, N_PAD), lambda i: (i, 0)),
        compiler_params=pltpu.CompilerParams(
            dimension_semantics=("parallel",),   # shard batch tiles across TCs (v7x)
            vmem_limit_bytes=32 << 20,           # safe for v7x's 64 MiB physical VMEM
        ),
    )(x_p, w1, b1, w2, b2, w3, b3)

    # Drop batch padding and the 3->128 output-lane padding.
    return out_padded[:B, :OUT_FEATURES]


def init_params(key):
    """Deterministic synthetic parameters at the logical (unpadded) shapes."""
    k1, k2, k3, k4, k5, k6 = jax.random.split(key, 6)
    # PyTorch nn.Linear weight is [out, in]; we store the transpose [in, out].
    w1 = jax.random.normal(k1, (IN_FEATURES, HIDDEN), jnp.float32) * 0.1
    b1 = jax.random.normal(k2, (1, HIDDEN), jnp.float32) * 0.1
    w2 = jax.random.normal(k3, (HIDDEN, HIDDEN), jnp.float32) * 0.05
    b2 = jax.random.normal(k4, (1, HIDDEN), jnp.float32) * 0.1
    w3 = jax.random.normal(k5, (HIDDEN, OUT_FEATURES), jnp.float32) * 0.05
    b3 = jax.random.normal(k6, (1, OUT_FEATURES), jnp.float32) * 0.1
    return dict(w1=w1, b1=b1, w2=w2, b2=b2, w3=w3, b3=b3)


def prepare_params(params, param_dtype=jnp.float32):
    """One-time padding of params to lane-dense kernel layout.

    Use param_dtype=jnp.bfloat16 on v6e/v7x for ~2x MXU rate and halved
    weight DMA (f32 accumulation is kept inside the kernel).
    """
    w1 = jnp.pad(params["w1"], ((0, K_PAD - IN_FEATURES), (0, 0)))
    w3 = jnp.pad(params["w3"], ((0, 0), (0, N_PAD - OUT_FEATURES)))
    b3 = jnp.pad(params["b3"], ((0, 0), (0, N_PAD - OUT_FEATURES)))
    return dict(
        w1=w1.astype(param_dtype),
        b1=params["b1"].astype(param_dtype),
        w2=params["w2"].astype(param_dtype),
        b2=params["b2"].astype(param_dtype),
        w3=w3.astype(param_dtype),
        b3=b3.astype(param_dtype),
    )


if __name__ == "__main__":
    key = jax.random.PRNGKey(0)
    pkey, xkey = jax.random.split(key)
    params = init_params(pkey)
    kernel_params = prepare_params(params, param_dtype=jnp.float32)

    # Batch of snake state vectors (12 features).  B=256 exercises the batch
    # grid (2 tiles of 128); amortize dispatch/weight-DMA by batching many
    # states (or scanning steps) per call.
    B = 256
    x = jax.random.normal(xkey, (B, IN_FEATURES), jnp.float32)

    out = my_model_forward(x, kernel_params)
    out = jax.block_until_ready(out)

    # Sanity check against a plain-JAX reference with the unpadded params.
    h1 = jnp.maximum(x @ params["w1"] + params["b1"], 0.0)
    h2 = jnp.maximum(h1 @ params["w2"] + params["b2"], 0.0)
    ref = h2 @ params["w3"] + params["b3"]
    assert out.shape == (B, OUT_FEATURES)
    assert jnp.allclose(out, ref, atol=1e-5, rtol=1e-5)

    print("KERNEL_OK")
</pallas_src>

<mosaic_0001>
module attributes {stable_mosaic.version = 11 : i64} {
  func.func @_mlp_kernel(%arg0: i32, %arg1: memref<128x128xf32, #tpu.memory_space<vmem>>, %arg2: memref<128x256xf32, #tpu.memory_space<vmem>>, %arg3: memref<1x256xf32, #tpu.memory_space<vmem>>, %arg4: memref<256x256xf32, #tpu.memory_space<vmem>>, %arg5: memref<1x256xf32, #tpu.memory_space<vmem>>, %arg6: memref<256x128xf32, #tpu.memory_space<vmem>>, %arg7: memref<1x128xf32, #tpu.memory_space<vmem>>, %arg8: memref<128x128xf32, #tpu.memory_space<vmem>>) attributes {dimension_semantics = [#tpu.dimension_semantics<parallel>], iteration_bounds = array<i64: 2>, scalar_prefetch = 0 : i64, scratch_operands = 0 : i64, tpu.core_type = #tpu.core_type<tc>, window_params = [{transform_indices = @transform_0, window_bounds = array<i64: 128, 128>}, {pipeline_mode = #tpu.pipeline_mode<synchronous>, transform_indices = @transform_1, window_bounds = array<i64: 128, 256>}, {pipeline_mode = #tpu.pipeline_mode<synchronous>, transform_indices = @transform_2, window_bounds = array<i64: 1, 256>}, {pipeline_mode = #tpu.pipeline_mode<synchronous>, transform_indices = @transform_3, window_bounds = array<i64: 256, 256>}, {pipeline_mode = #tpu.pipeline_mode<synchronous>, transform_indices = @transform_4, window_bounds = array<i64: 1, 256>}, {pipeline_mode = #tpu.pipeline_mode<synchronous>, transform_indices = @transform_5, window_bounds = array<i64: 256, 128>}, {pipeline_mode = #tpu.pipeline_mode<synchronous>, transform_indices = @transform_6, window_bounds = array<i64: 1, 128>}, {transform_indices = @transform_7, window_bounds = array<i64: 128, 128>}]} {
    %c0 = arith.constant 0 : index
    %c0_0 = arith.constant 0 : index
    %0 = vector.load %arg1[%c0, %c0_0] : memref<128x128xf32, #tpu.memory_space<vmem>>, vector<128x128xf32>
    %c0_1 = arith.constant 0 : index
    %c0_2 = arith.constant 0 : index
    %1 = vector.load %arg2[%c0_1, %c0_2] : memref<128x256xf32, #tpu.memory_space<vmem>>, vector<128x256xf32>
    %cst = arith.constant dense<0.000000e+00> : vector<128x256xf32>
    %2 = tpu.matmul %0, %1, %cst {dimension_numbers = #tpu.dot_dimension_numbers<[1], [0], [0], [1], [0, 0, 1, 1], [], []>} : vector<128x128xf32>, vector<128x256xf32>, vector<128x256xf32> -> vector<128x256xf32>
    %c0_3 = arith.constant 0 : index
    %c0_4 = arith.constant 0 : index
    %3 = vector.load %arg3[%c0_3, %c0_4] : memref<1x256xf32, #tpu.memory_space<vmem>>, vector<1x256xf32>
    %4 = vector.broadcast %3 : vector<1x256xf32> to vector<128x256xf32>
    %5 = arith.addf %2, %4 : vector<128x256xf32>
    %cst_5 = arith.constant 0.000000e+00 : f32
    %6 = vector.broadcast %cst_5 : f32 to vector<128x256xf32>
    %7 = arith.maximumf %5, %6 : vector<128x256xf32>
    %c0_6 = arith.constant 0 : index
    %c0_7 = arith.constant 0 : index
    %8 = vector.load %arg4[%c0_6, %c0_7] : memref<256x256xf32, #tpu.memory_space<vmem>>, vector<256x256xf32>
    %cst_8 = arith.constant dense<0.000000e+00> : vector<128x256xf32>
    %9 = tpu.matmul %7, %8, %cst_8 {dimension_numbers = #tpu.dot_dimension_numbers<[1], [0], [0], [1], [0, 0, 1, 1], [], []>} : vector<128x256xf32>, vector<256x256xf32>, vector<128x256xf32> -> vector<128x256xf32>
    %c0_9 = arith.constant 0 : index
    %c0_10 = arith.constant 0 : index
    %10 = vector.load %arg5[%c0_9, %c0_10] : memref<1x256xf32, #tpu.memory_space<vmem>>, vector<1x256xf32>
    %11 = vector.broadcast %10 : vector<1x256xf32> to vector<128x256xf32>
    %12 = arith.addf %9, %11 : vector<128x256xf32>
    %cst_11 = arith.constant 0.000000e+00 : f32
    %13 = vector.broadcast %cst_11 : f32 to vector<128x256xf32>
    %14 = arith.maximumf %12, %13 : vector<128x256xf32>
    %c0_12 = arith.constant 0 : index
    %c0_13 = arith.constant 0 : index
    %15 = vector.load %arg6[%c0_12, %c0_13] : memref<256x128xf32, #tpu.memory_space<vmem>>, vector<256x128xf32>
    %cst_14 = arith.constant dense<0.000000e+00> : vector<128x128xf32>
    %16 = tpu.matmul %14, %15, %cst_14 {dimension_numbers = #tpu.dot_dimension_numbers<[1], [0], [0], [1], [0, 0, 1, 1], [], []>} : vector<128x256xf32>, vector<256x128xf32>, vector<128x128xf32> -> vector<128x128xf32>
    %c0_15 = arith.constant 0 : index
    %c0_16 = arith.constant 0 : index
    %17 = vector.load %arg7[%c0_15, %c0_16] : memref<1x128xf32, #tpu.memory_space<vmem>>, vector<1x128xf32>
    %18 = vector.broadcast %17 : vector<1x128xf32> to vector<128x128xf32>
    %19 = arith.addf %16, %18 : vector<128x128xf32>
    %c0_17 = arith.constant 0 : index
    %c0_18 = arith.constant 0 : index
    %20 = vector.load %arg8[%c0_17, %c0_18] : memref<128x128xf32, #tpu.memory_space<vmem>>, vector<128x128xf32>
    tpu.vector_store %arg8[%c0_17, %c0_18], %19 {strides = array<i32>} : memref<128x128xf32, #tpu.memory_space<vmem>>, vector<128x128xf32>,
    return
  }
  func.func @transform_0(%arg0: i32) -> (i32, i32) {
    %c0_i32 = arith.constant 0 : i32
    %c0_i32_0 = arith.constant 0 : i32
    return %arg0, %c0_i32 : i32, i32
  }
  func.func @transform_1(%arg0: i32) -> (i32, i32) {
    %c0_i32 = arith.constant 0 : i32
    %c0_i32_0 = arith.constant 0 : i32
    %c0_i32_1 = arith.constant 0 : i32
    return %c0_i32, %c0_i32_0 : i32, i32
  }
  func.func @transform_2(%arg0: i32) -> (i32, i32) {
    %c0_i32 = arith.constant 0 : i32
    %c0_i32_0 = arith.constant 0 : i32
    %c0_i32_1 = arith.constant 0 : i32
    return %c0_i32, %c0_i32_0 : i32, i32
  }
  func.func @transform_3(%arg0: i32) -> (i32, i32) {
    %c0_i32 = arith.constant 0 : i32
    %c0_i32_0 = arith.constant 0 : i32
    %c0_i32_1 = arith.constant 0 : i32
    return %c0_i32, %c0_i32_0 : i32, i32
  }
  func.func @transform_4(%arg0: i32) -> (i32, i32) {
    %c0_i32 = arith.constant 0 : i32
    %c0_i32_0 = arith.constant 0 : i32
    %c0_i32_1 = arith.constant 0 : i32
    return %c0_i32, %c0_i32_0 : i32, i32
  }
  func.func @transform_5(%arg0: i32) -> (i32, i32) {
    %c0_i32 = arith.constant 0 : i32
    %c0_i32_0 = arith.constant 0 : i32
    %c0_i32_1 = arith.constant 0 : i32
    return %c0_i32, %c0_i32_0 : i32, i32
  }
  func.func @transform_6(%arg0: i32) -> (i32, i32) {
    %c0_i32 = arith.constant 0 : i32
    %c0_i32_0 = arith.constant 0 : i32
    %c0_i32_1 = arith.constant 0 : i32
    return %c0_i32, %c0_i32_0 : i32, i32
  }
  func.func @transform_7(%arg0: i32) -> (i32, i32) {
    %c0_i32 = arith.constant 0 : i32
    %c0_i32_0 = arith.constant 0 : i32
    return %arg0, %c0_i32 : i32, i32
  }
}

</mosaic_0001>

<bundles_post_ra>
// kernel: my_model_forward.1
= control target key start
LH: loop header
LB: loop body
LE: loop exit
PB: predicated region body
PF: predicated region fallthrough
CT: control target
= control target key end

     0   :  { %12 = vsyncpa [#allocation3], 0  ;;  %s1247_s24 = smov 0   ;;  %s1701_s0 = inlined_call_operand.vmem [shape: f32[256,128], index: 0, kind: input, shape index: {}]   ;;  %s1702_s1 = inlined_call_operand.vmem [shape: f32[128,256], index: 1, kind: input, shape index: {}]   ;;  %s1703_s2 = inlined_call_operand.vmem [shape: f32[1,256], index: 2, kind: input, shape index: {}]   ;;  %s1704_s3 = inlined_call_operand.vmem [shape: f32[256,256], index: 3, kind: input, shape index: {}]   ;;  %s1705_s4 = inlined_call_operand.vmem [shape: f32[1,256], index: 4, kind: input, shape index: {}]   ;;  %s1706_s5 = inlined_call_operand.hbm [shape: f32[256,128], index: 5, kind: input, shape index: {}]   ;;  %s1707_s6 = inlined_call_operand.vmem [shape: f32[1,128], index: 6, kind: input, shape index: {}]   ;;  %s1708_s7 = inlined_call_operand.vmem [shape: f32[256,128], index: 7, kind: output, shape index: {}]  }
   0x1 LB: > { %s224_s27 = sshll.u32 %s1706_s5, 4  ;;  %s1127_s28 = sadd.s32 4294967295, %s1202_s24   ;;  %s1202_s24 = sphi %s1247_s24, %s18_s24   ;;  %s225_s27 = int_to_ptr.hbm [resolvable:$true] %s224_s27 }
   0x2   : > { %p1129_p0 = scmp.ge.s32.totalorder %s1202_s24, 1  ;;  %p201_p1 = scmp.lt.s32.totalorder %s1202_s24, 3 }
   0x3   : > { %p1148_p2 = scmp.eq.s32.totalorder %s1127_s28, 0  ;;  %s1204_s29 = smov [#allocation2]  }
   0x4   : > { %p202_p3 = pnand %p1129_p0, %p201_p1  ;;  %s226_s30 = sshll.u32 %s1204_s29, 4  ;;  %s227_s30 = int_to_ptr.vmem [resolvable:$true] %s226_s30 }
   0x5   : > { %s1205_s8 = smov 128   ;;  %s1206_s9 = smov 8  }
   0x6   : > { %p1144_p4 = pneg %p202_p3  ;;  %254 = sbr.rel (%p202_p3) target bundleno = 569 (0x239), region = 48 }
   0x8   : > { %p1145_p5 = pnand %p1148_p2, %p1144_p4 }
   0xa   : > { %1147 = dma.hbm_to_vmem [thread:$0]  (!%p1145_p5), %s225_s27, 4096, %s227_s30, [#allocation3], %s1205_s8, %s1205_s8, %s1206_s9  }
   0xb   : > { %1197 = dma.done.wait (%p1148_p2), [#allocation3], 4096  }
   0xc   : > { %1199 = vsyncadd (%p1148_p2), [#allocation3], 4294963200  ;;  %v345_v0 = vld [vmem:[%s1702_s1 + $0xf0] sm:$0xff]  ;;  %v343_v1 = vld [vmem:[%s1702_s1 + $0xe0] sm:$0xff]  ;;  %s1134_s21 = sshll.u32 %s1127_s28, 4 }
   0xd   : > { %v346_v2 = vld [vmem:[%s1702_s1 + $0xf8] sm:$0xff]  ;;  %353 = vmatpush.msra.mxu0 %v345_v0  ;;  %v344_v3 = vld [vmem:[%s1702_s1 + $0xe8] sm:$0xff]  ;;  %v341_v4 = vld [vmem:[%s1702_s1 + $0xd0] sm:$0xff]  ;;  %p288_p6 = scmp.lt.s32.totalorder %s1134_s21, 31 }
   0xe   : > { %418 = vmatpush.msra.mxu1 %v346_v2  ;;  %v342_v5 = vld [vmem:[%s1702_s1 + $0xd8] sm:$0xff]  ;;  %v339_v6 = vld [vmem:[%s1702_s1 + $0xc0] sm:$0xff]  ;;  %v340_v7 = vld [vmem:[%s1702_s1 + $0xc8] sm:$0xff] }
   0xf   : > { %354 = vmatpush.msra.mxu0 %v343_v1  ;;  %v337_v8 = vld [vmem:[%s1702_s1 + $0xb0] sm:$0xff]  ;;  %v338_v9 = vld [vmem:[%s1702_s1 + $0xb8] sm:$0xff]  ;;  %v335_v10 = vld [vmem:[%s1702_s1 + $0xa0] sm:$0xff]  ;;  %s1710_s21 = smov (!%p288_p6, %s1134_s21), 31 }
  0x10   : > { %419 = vmatpush.msra.mxu1 %v344_v3  ;;  %v336_v11 = vld [vmem:[%s1702_s1 + $0xa8] sm:$0xff]  ;;  %v333_v12 = vld [vmem:[%s1702_s1 + $0x90] sm:$0xff]  ;;  %v334_v13 = vld [vmem:[%s1702_s1 + $0x98] sm:$0xff]  ;;  %s1135_s20 = sshll.u32 %s1710_s21, 3 }
  0x11   : > { %355 = vmatpush.msra.mxu0 %v341_v4  ;;  %v331_v14 = vld [vmem:[%s1702_s1 + $0x80] sm:$0xff]  ;;  %v332_v15 = vld [vmem:[%s1702_s1 + $0x88] sm:$0xff]  ;;  %v329_v16 = vld [vmem:[%s1702_s1 + $0x70] sm:$0xff]  ;;  %s1360_s10 = scalar_lea.vmem %s1701_s0, %s1135_s20  ;;  %s1665_s17 = scalar_lea.vmem %s1708_s7, %s1135_s20 }
  0x12   : > { %420 = vmatpush.msra.mxu1 %v342_v5  ;;  %v330_v17 = vld [vmem:[%s1702_s1 + $0x78] sm:$0xff]  ;;  %v327_v18 = vld [vmem:[%s1702_s1 + $0x60] sm:$0xff]  ;;  %v328_v19 = vld [vmem:[%s1702_s1 + $0x68] sm:$0xff] }
  0x13   : > { %356 = vmatpush.msra.mxu0 %v339_v6  ;;  %v325_v20 = vld [vmem:[%s1702_s1 + $0x50] sm:$0xff]  ;;  %v326_v21 = vld [vmem:[%s1702_s1 + $0x58] sm:$0xff]  ;;  %v323_v22 = vld [vmem:[%s1702_s1 + $0x40] sm:$0xff] }
  0x14   : > { %421 = vmatpush.msra.mxu1 %v340_v7  ;;  %v324_v23 = vld [vmem:[%s1702_s1 + $0x48] sm:$0xff]  ;;  %v321_v24 = vld [vmem:[%s1702_s1 + $0x30] sm:$0xff]  ;;  %v322_v25 = vld [vmem:[%s1702_s1 + $0x38] sm:$0xff] }
  0x15   : > { %357 = vmatpush.msra.mxu0 %v337_v8  ;;  %v319_v26 = vld [vmem:[%s1702_s1 + $0x20] sm:$0xff]  ;;  %v320_v27 = vld [vmem:[%s1702_s1 + $0x28] sm:$0xff]  ;;  %v317_v28 = vld [vmem:[%s1702_s1 + $0x10] sm:$0xff] }
  0x16   : > { %422 = vmatpush.msra.mxu1 %v338_v9  ;;  %v318_v29 = vld [vmem:[%s1702_s1 + $0x18] sm:$0xff]  ;;  %v315_v30 = vld [vmem:[%s1702_s1] sm:$0xff]  ;;  %v316_v31 = vld [vmem:[%s1702_s1 + $0x8] sm:$0xff] }
  0x17   : > { %358 = vmatpush.msra.mxu0 %v335_v10  ;;  %v299_v32 = vld [vmem:[%s1360_s10] sm:$0xff]  ;;  %v546_v33 = vld [vmem:[%s1704_s3 + $0xf8] sm:$0xff]  ;;  %v544_v35 = vld [vmem:[%s1704_s3 + $0xe8] sm:$0xff] }
  0x18   : > { %423 = vmatpush.msra.mxu1 %v336_v11  ;;  %v578_v34 = vld [vmem:[%s1704_s3 + $0x1f8] sm:$0xff]  ;;  %v576_v36 = vld [vmem:[%s1704_s3 + $0x1e8] sm:$0xff]  ;;  %v301_v44 = vld [vmem:[%s1360_s10 + $0x10] sm:$0xff] }
  0x19   : > { %359 = vmatpush.msra.mxu0 %v333_v12  ;;  %v542_v37 = vld [vmem:[%s1704_s3 + $0xd8] sm:$0xff]  ;;  %v540_v39 = vld [vmem:[%s1704_s3 + $0xc8] sm:$0xff]  ;;  %v303_v50 = vld [vmem:[%s1360_s10 + $0x20] sm:$0xff] }
  0x1a   : > { %424 = vmatpush.msra.mxu1 %v334_v13  ;;  %v574_v38 = vld [vmem:[%s1704_s3 + $0x1d8] sm:$0xff]  ;;  %v572_v40 = vld [vmem:[%s1704_s3 + $0x1c8] sm:$0xff]  ;;  %v305_v56 = vld [vmem:[%s1360_s10 + $0x30] sm:$0xff] }
  0x1b   : > { %360 = vmatpush.msra.mxu0 %v331_v14  ;;  %v300_v41 = vld [vmem:[%s1360_s10 + $0x8] sm:$0xff]  ;;  %v538_v42 = vld [vmem:[%s1704_s3 + $0xb8] sm:$0xff]  ;;  %v307_v62 = vld [vmem:[%s1360_s10 + $0x40] sm:$0xff] }
  0x1c   : > { %425 = vmatpush.msra.mxu1 %v332_v15  ;;  %v570_v43 = vld [vmem:[%s1704_s3 + $0x1b8] sm:$0xff]  ;;  %v536_v45 = vld [vmem:[%s1704_s3 + $0xa8] sm:$0xff]  ;;  %v545_v0 = vld [vmem:[%s1704_s3 + $0xf0] sm:$0xff] }
  0x1d   : > { %361 = vmatpush.msra.mxu0 %v329_v16  ;;  %v568_v46 = vld [vmem:[%s1704_s3 + $0x1a8] sm:$0xff]  ;;  %v302_v47 = vld [vmem:[%s1360_s10 + $0x18] sm:$0xff]  ;;  %585 = vmatpush.msra.mxu2 %v545_v0  ;;  %v543_v2 = vld [vmem:[%s1704_s3 + $0xe0] sm:$0xff] }
  0x1e   : > { %426 = vmatpush.msra.mxu1 %v330_v17  ;;  %v534_v48 = vld [vmem:[%s1704_s3 + $0x98] sm:$0xff]  ;;  %v532_v51 = vld [vmem:[%s1704_s3 + $0x88] sm:$0xff]  ;;  %v577_v3 = vld [vmem:[%s1704_s3 + $0x1f0] sm:$0xff] }
  0x1f   : > { %362 = vmatpush.msra.mxu0 %v327_v18  ;;  %v566_v49 = vld [vmem:[%s1704_s3 + $0x198] sm:$0xff]  ;;  %v564_v52 = vld [vmem:[%s1704_s3 + $0x188] sm:$0xff]  ;;  %650 = vmatpush.msra.mxu3 %v577_v3  ;;  %v541_v4 = vld [vmem:[%s1704_s3 + $0xd0] sm:$0xff] }
  0x20   : > { %427 = vmatpush.msra.mxu1 %v328_v19  ;;  %v304_v53 = vld [vmem:[%s1360_s10 + $0x28] sm:$0xff]  ;;  %v530_v54 = vld [vmem:[%s1704_s3 + $0x78] sm:$0xff]  ;;  %v575_v5 = vld [vmem:[%s1704_s3 + $0x1e0] sm:$0xff]  ;;  %586 = vmatpush.msra.mxu2 %v543_v2 }
  0x21   : > { %363 = vmatpush.msra.mxu0 %v325_v20  ;;  %v562_v55 = vld [vmem:[%s1704_s3 + $0x178] sm:$0xff]  ;;  %v528_v57 = vld [vmem:[%s1704_s3 + $0x68] sm:$0xff]  ;;  %651 = vmatpush.msra.mxu3 %v575_v5  ;;  %v539_v7 = vld [vmem:[%s1704_s3 + $0xc0] sm:$0xff] }
  0x22   : > { %428 = vmatpush.msra.mxu1 %v326_v21  ;;  %v560_v58 = vld [vmem:[%s1704_s3 + $0x168] sm:$0xff]  ;;  %v306_v59 = vld [vmem:[%s1360_s10 + $0x38] sm:$0xff]  ;;  %587 = vmatpush.msra.mxu2 %v541_v4  ;;  %v573_v8 = vld [vmem:[%s1704_s3 + $0x1d0] sm:$0xff] }
  0x23   : > { %364 = vmatpush.msra.mxu0 %v323_v22  ;;  %v526_v60 = vld [vmem:[%s1704_s3 + $0x58] sm:$0xff]  ;;  %v524_v63 = vld [vmem:[%s1704_s3 + $0x48] sm:$0xff]  ;;  %652 = vmatpush.msra.mxu3 %v573_v8  ;;  %v537_v10 = vld [vmem:[%s1704_s3 + $0xb0] sm:$0xff] }
  0x24   : > { %429 = vmatpush.msra.mxu1 %v324_v23  ;;  %v558_v61 = vld [vmem:[%s1704_s3 + $0x158] sm:$0xff]  ;;  %v556_v1 = vld [vmem:[%s1704_s3 + $0x148] sm:$0xff]  ;;  %588 = vmatpush.msra.mxu2 %v539_v7  ;;  %v571_v11 = vld [vmem:[%s1704_s3 + $0x1c0] sm:$0xff] }
  0x25   : > { %365 = vmatpush.msra.mxu0 %v321_v24  ;;  %v308_v6 = vld [vmem:[%s1360_s10 + $0x48] sm:$0xff]  ;;  %v522_v9 = vld [vmem:[%s1704_s3 + $0x38] sm:$0xff]  ;;  %v535_v13 = vld [vmem:[%s1704_s3 + $0xa0] sm:$0xff]  ;;  %653 = vmatpush.msra.mxu3 %v571_v11 }
  0x26   : > { %430 = vmatpush.msra.mxu1 %v322_v25  ;;  %v554_v12 = vld [vmem:[%s1704_s3 + $0x138] sm:$0xff]  ;;  %v569_v14 = vld [vmem:[%s1704_s3 + $0x1b0] sm:$0xff]  ;;  %589 = vmatpush.msra.mxu2 %v537_v10  ;;  %v567_v16 = vld [vmem:[%s1704_s3 + $0x1a0] sm:$0xff] }
  0x27   : > { %366 = vmatpush.msra.mxu0 %v319_v26  ;;  %v533_v15 = vld [vmem:[%s1704_s3 + $0x90] sm:$0xff]  ;;  %654 = vmatpush.msra.mxu3 %v569_v14  ;;  %v531_v18 = vld [vmem:[%s1704_s3 + $0x80] sm:$0xff]  ;;  %v520_v20 = vld [vmem:[%s1704_s3 + $0x28] sm:$0xff] }
  0x28   : > { %431 = vmatpush.msra.mxu1 %v320_v27  ;;  %v309_v17 = vld [vmem:[%s1360_s10 + $0x50] sm:$0xff]  ;;  %590 = vmatpush.msra.mxu2 %v535_v13  ;;  %v563_v22 = vld [vmem:[%s1704_s3 + $0x180] sm:$0xff]  ;;  %v552_v23 = vld [vmem:[%s1704_s3 + $0x128] sm:$0xff] }
  0x29   : > { %367 = vmatpush.msra.mxu0 %v317_v28  ;;  %655 = vmatpush.msra.mxu3 %v567_v16  ;;  %v565_v19 = vld [vmem:[%s1704_s3 + $0x190] sm:$0xff]  ;;  %v527_v24 = vld [vmem:[%s1704_s3 + $0x60] sm:$0xff]  ;;  %v310_v28 = vld [vmem:[%s1360_s10 + $0x58] sm:$0xff] }
  0x2a   : > { %432 = vmatpush.msra.mxu1 %v318_v29  ;;  %591 = vmatpush.msra.mxu2 %v533_v15  ;;  %v529_v21 = vld [vmem:[%s1704_s3 + $0x70] sm:$0xff]  ;;  %v559_v27 = vld [vmem:[%s1704_s3 + $0x160] sm:$0xff]  ;;  %v888_v7 = vld [vmem:[#allocation2 + $0x58] sm:$0xff] }
  0x2b   : > { %368 = vmatpush.msra.mxu0 %v315_v30  ;;  %656 = vmatpush.msra.mxu3 %v565_v19  ;;  %v561_v25 = vld [vmem:[%s1704_s3 + $0x170] sm:$0xff]  ;;  %v523_v29 = vld [vmem:[%s1704_s3 + $0x40] sm:$0xff] }
  0x2c   : > { %433 = vmatpush.msra.mxu1 %v316_v31  ;;  %369 = vmatmul.f32.vlgmr.msra.gmra.mxu0 %v299_v32  ;;  %v525_v26 = vld [vmem:[%s1704_s3 + $0x50] sm:$0xff]  ;;  %v518_v31 = vld [vmem:[%s1704_s3 + $0x18] sm:$0xff]  ;;  %v905_v4 = vld [vmem:[#allocation2 + $0xe0] sm:$0xff] }
  0x2d   : > { %434 = vmatmul.f32.vlgmr.msra.gmra.mxu1 %v299_v32  ;;  %715 = vmatpush.msrb.mxu0 %v546_v33  ;;  %v557_v30 = vld [vmem:[%s1704_s3 + $0x150] sm:$0xff]  ;;  %v555_v33 = vld [vmem:[%s1704_s3 + $0x140] sm:$0xff] }
  0x2e   : > { %780 = vmatpush.msrb.mxu1 %v578_v34  ;;  %592 = vmatpush.msra.mxu2 %v531_v18  ;;  %v521_v32 = vld [vmem:[%s1704_s3 + $0x30] sm:$0xff]  ;;  %v550_v34 = vld [vmem:[%s1704_s3 + $0x118] sm:$0xff] }
  0x2f   : > { %716 = vmatpush.msrb.mxu0 %v544_v35  ;;  %657 = vmatpush.msra.mxu3 %v563_v22  ;;  %v519_v35 = vld [vmem:[%s1704_s3 + $0x20] sm:$0xff]  ;;  %v887_v15 = vld [vmem:[#allocation2 + $0x50] sm:$0xff] }
  0x30   : > { %781 = vmatpush.msrb.mxu1 %v576_v36  ;;  %593 = vmatpush.msra.mxu2 %v529_v21  ;;  %v553_v36 = vld [vmem:[%s1704_s3 + $0x130] sm:$0xff] }
  0x31   : > { %717 = vmatpush.msrb.mxu0 %v542_v37  ;;  %658 = vmatpush.msra.mxu3 %v561_v25  ;;  %v311_v37 = vld [vmem:[%s1360_s10 + $0x60] sm:$0xff] }
  0x32   : > { %782 = vmatpush.msrb.mxu1 %v574_v38  ;;  %594 = vmatpush.msra.mxu2 %v527_v24  ;;  %v517_v38 = vld [vmem:[%s1704_s3 + $0x10] sm:$0xff] }
  0x33   : > { %718 = vmatpush.msrb.mxu0 %v540_v39  ;;  %659 = vmatpush.msra.mxu3 %v559_v27  ;;  %v551_v39 = vld [vmem:[%s1704_s3 + $0x120] sm:$0xff] }
  0x34   : > { %783 = vmatpush.msrb.mxu1 %v572_v40  ;;  %372 = vmatmul.f32.gmra.mxu0 %v300_v41  ;;  %v515_v40 = vld [vmem:[%s1704_s3] sm:$0xff] }
  0x35   : > { %437 = vmatmul.f32.gmra.mxu1 %v300_v41  ;;  %719 = vmatpush.msrb.mxu0 %v538_v42  ;;  %v549_v41 = vld [vmem:[%s1704_s3 + $0x110] sm:$0xff]  ;;  %v516_v42 = vld [vmem:[%s1704_s3 + $0x8] sm:$0xff] }
  0x36   : > { %784 = vmatpush.msrb.mxu1 %v570_v43  ;;  %595 = vmatpush.msra.mxu2 %v525_v26  ;;  %v547_v43 = vld [vmem:[%s1704_s3 + $0x100] sm:$0xff] }
  0x37   : > { %720 = vmatpush.msrb.mxu0 %v536_v45  ;;  %660 = vmatpush.msra.mxu3 %v557_v30  ;;  %v312_v45 = vld [vmem:[%s1360_s10 + $0x68] sm:$0xff] }
  0x38   : > { %785 = vmatpush.msrb.mxu1 %v568_v46  ;;  %596 = vmatpush.msra.mxu2 %v523_v29  ;;  %v892_v46 = vld [vmem:[#allocation2 + $0x78] sm:$0xff]  ;;  %v902_v30 = vld [vmem:[#allocation2 + $0xc8] sm:$0xff] }
  0x39   : > { %721 = vmatpush.msrb.mxu0 %v534_v48  ;;  %661 = vmatpush.msra.mxu3 %v555_v33  ;;  %v908_v48 = vld [vmem:[#allocation2 + $0xf8] sm:$0xff] }
  0x3a   : > { %786 = vmatpush.msrb.mxu1 %v566_v49  ;;  %597 = vmatpush.msra.mxu2 %v521_v32  ;;  %v891_v49 = vld [vmem:[#allocation2 + $0x70] sm:$0xff] }
  0x3b   : > { %722 = vmatpush.msrb.mxu0 %v532_v51  ;;  %662 = vmatpush.msra.mxu3 %v553_v36  ;;  %v907_v51 = vld [vmem:[#allocation2 + $0xf0] sm:$0xff] }
  0x3c   : > { %375 = vmatmul.f32.gmra.mxu0 %v301_v44  ;;  %787 = vmatpush.msrb.mxu1 %v564_v52  ;;  %v347_v52 = vld [vmem:[%s1703_s2] sm:$0x3] }
  0x3d   : > { %440 = vmatmul.f32.gmra.mxu1 %v301_v44  ;;  %723 = vmatpush.msrb.mxu0 %v530_v54  ;;  %v548_v44 = vld [vmem:[%s1704_s3 + $0x108] sm:$0xff]  ;;  %v1581_v54 = vperm.slane %v347_v52, 1 }
  0x3e   : > { %788 = vmatpush.msrb.mxu1 %v562_v55  ;;  %598 = vmatpush.msra.mxu2 %v519_v35  ;;  %v890_v55 = vld [vmem:[#allocation2 + $0x68] sm:$0xff] }
  0x3f   : > { %724 = vmatpush.msrb.mxu0 %v528_v57  ;;  %663 = vmatpush.msra.mxu3 %v551_v39  ;;  %v884_v39 = vld [vmem:[#allocation2 + $0x38] sm:$0xff] }
  0x40   : > { %789 = vmatpush.msrb.mxu1 %v560_v58  ;;  %599 = vmatpush.msra.mxu2 %v517_v38  ;;  %v901_v38 = vld [vmem:[#allocation2 + $0xc0] sm:$0xff] }
  0x41   : > { %725 = vmatpush.msrb.mxu0 %v526_v60  ;;  %664 = vmatpush.msra.mxu3 %v549_v41  ;;  %v906_v60 = vld [vmem:[#allocation2 + $0xe8] sm:$0xff] }
  0x42   : > { %790 = vmatpush.msrb.mxu1 %v558_v61  ;;  %600 = vmatpush.msra.mxu2 %v515_v40 }
  0x43   : > { %726 = vmatpush.msrb.mxu0 %v524_v63  ;;  %665 = vmatpush.msra.mxu3 %v547_v43  ;;  %v889_v63 = vld [vmem:[#allocation2 + $0x60] sm:$0xff] }
  0x44   : > { %378 = vmatmul.f32.gmra.mxu0 %v302_v47  ;;  %791 = vmatpush.msrb.mxu1 %v556_v1 }
  0x45   : > { %443 = vmatmul.f32.gmra.mxu1 %v302_v47  ;;  %727 = vmatpush.msrb.mxu0 %v522_v9  ;;  %v313_v47 = vld [vmem:[%s1360_s10 + $0x70] sm:$0xff] }
  0x46   : > { %792 = vmatpush.msrb.mxu1 %v554_v12  ;;  %913 = vmatpush.msrb.mxu2 %v892_v46  ;;  %v904_v12 = vld [vmem:[#allocation2 + $0xd8] sm:$0xff] }
  0x47   : > { %728 = vmatpush.msrb.mxu0 %v520_v20  ;;  %978 = vmatpush.msrb.mxu3 %v908_v48  ;;  %v903_v20 = vld [vmem:[#allocation2 + $0xd0] sm:$0xff]  ;;  %v900_v46 = vld [vmem:[#allocation2 + $0xb8] sm:$0xff] }
  0x48   : > { %793 = vmatpush.msrb.mxu1 %v552_v23  ;;  %914 = vmatpush.msrb.mxu2 %v891_v49  ;;  %v886_v23 = vld [vmem:[#allocation2 + $0x48] sm:$0xff] }
  0x49   : > { %729 = vmatpush.msrb.mxu0 %v518_v31  ;;  %979 = vmatpush.msrb.mxu3 %v907_v51  ;;  %v885_v31 = vld [vmem:[#allocation2 + $0x40] sm:$0xff] }
  0x4a   : > { %794 = vmatpush.msrb.mxu1 %v550_v34  ;;  %915 = vmatpush.msrb.mxu2 %v890_v55 }
  0x4b   : > { %730 = vmatpush.msrb.mxu0 %v516_v42  ;;  %980 = vmatpush.msrb.mxu3 %v906_v60 }
  0x4c   : > { %381 = vmatmul.f32.gmra.mxu0 %v303_v50  ;;  %795 = vmatpush.msrb.mxu1 %v548_v44 }
  0x4d   : > { %446 = vmatmul.f32.gmra.mxu1 %v303_v50  ;;  %v314_v50 = vld [vmem:[%s1360_s10 + $0x78] sm:$0xff]  ;;  %916 = vmatpush.msrb.mxu2 %v889_v63 }
  0x4e   : > { %981 = vmatpush.msrb.mxu3 %v905_v4 }
  0x4f   : > { %917 = vmatpush.msrb.mxu2 %v888_v7 }
  0x50   : > { %982 = vmatpush.msrb.mxu3 %v904_v12 }
  0x51   : > { %918 = vmatpush.msrb.mxu2 %v887_v15 }
  0x52   : > { %983 = vmatpush.msrb.mxu3 %v903_v20 }
  0x53   : > { %919 = vmatpush.msrb.mxu2 %v886_v23 }
  0x54   : > { %384 = vmatmul.f32.gmra.mxu0 %v304_v53  ;;  %984 = vmatpush.msrb.mxu3 %v902_v30 }
  0x55   : > { %449 = vmatmul.f32.gmra.mxu1 %v304_v53  ;;  %v1579_v53 = vperm.slane %v347_v52, 0  ;;  %920 = vmatpush.msrb.mxu2 %v885_v31 }
  0x56   : > { %985 = vmatpush.msrb.mxu3 %v901_v38 }
  0x57   : > { %921 = vmatpush.msrb.mxu2 %v884_v39 }
  0x58   : > { %986 = vmatpush.msrb.mxu3 %v900_v46 }
  0x5c   : > { %387 = vmatmul.f32.gmra.mxu0 %v305_v56 }
  0x5d   : > { %452 = vmatmul.f32.gmra.mxu1 %v305_v56 }
  0x64   : > { %390 = vmatmul.f32.gmra.mxu0 %v306_v59 }
  0x65   : > { %455 = vmatmul.f32.gmra.mxu1 %v306_v59 }
  0x6c   : > { %393 = vmatmul.f32.gmra.mxu0 %v307_v62 }
  0x6d   : > { %458 = vmatmul.f32.gmra.mxu1 %v307_v62 }
  0x74   : > { %396 = vmatmul.f32.gmra.mxu0 %v308_v6 }
  0x75   : > { %461 = vmatmul.f32.gmra.mxu1 %v308_v6 }
  0x7c   : > { %399 = vmatmul.f32.gmra.mxu0 %v309_v17 }
  0x7d   : > { %464 = vmatmul.f32.gmra.mxu1 %v309_v17 }
  0x84   : > { %402 = vmatmul.f32.gmra.mxu0 %v310_v28 }
  0x85   : > { %467 = vmatmul.f32.gmra.mxu1 %v310_v28 }
  0x8c   : > { %405 = vmatmul.f32.gmra.mxu0 %v311_v37 }
  0x8d   : > { %470 = vmatmul.f32.gmra.mxu1 %v311_v37 }
  0x94   : > { %408 = vmatmul.f32.gmra.mxu0 %v312_v45 }
  0x95   : > { %473 = vmatmul.f32.gmra.mxu1 %v312_v45 }
  0x9c   : > { %411 = vmatmul.f32.gmra.mxu0 %v313_v47 }
  0x9d   : > { %476 = vmatmul.f32.gmra.mxu1 %v313_v47  ;;  %v883_v47 = vld [vmem:[#allocation2 + $0x30] sm:$0xff] }
  0x9e   : > { %922 = vmatpush.msrb.mxu2 %v883_v47 }
  0xa4   : > { %414 = vmatmul.f32.gmra.mxu0 %v314_v50 }
  0xa5   : > { %479 = vmatmul.f32.gmra.mxu1 %v314_v50 }
  0xa9   : > { %v370_v56 = vpop.f32.mrf.mxu0 }
  0xaa   : > { %v435_v57 = vpop.f32.mrf.mxu1  ;;  %v371_v58 = vadd.f32 %v370_v56, %v1579_v53  ;;  %v899_v56 = vld [vmem:[#allocation2 + $0xb0] sm:$0xff] }
  0xab   : > { %v436_v59 = vadd.f32 %v435_v57, %v1581_v54  ;;  %987 = vmatpush.msrb.mxu3 %v899_v56  ;;  %v882_v57 = vld [vmem:[#allocation2 + $0x28] sm:$0xff] }
  0xac   : > { %v483_v61 = vmax.f32 %v371_v58, 0.0  ;;  %923 = vmatpush.msrb.mxu2 %v882_v57 }
  0xad   : > { %v484_v62 = vmax.f32 %v436_v59, 0.0 }
  0xae   : > { %601 = vmatmul.f32.vlgmr.msra.gmra.mxu2 %v483_v61  ;;  %731 = vmatmul.f32.vlgmr.msrb.gmra.mxu0 %v483_v61 }
  0xaf   : > { %666 = vmatmul.f32.vlgmr.msra.gmra.mxu3 %v484_v62  ;;  %796 = vmatmul.f32.vlgmr.msrb.gmra.mxu1 %v484_v62 }
  0xb1   : > { %v373_v0 = vpop.f32.mrf.mxu0 }
  0xb2   : > { %v438_v1 = vpop.f32.mrf.mxu1  ;;  %v374_v2 = vadd.f32 %v373_v0, %v1579_v53  ;;  %v898_v0 = vld [vmem:[#allocation2 + $0xa8] sm:$0xff] }
  0xb3   : > { %v439_v3 = vadd.f32 %v438_v1, %v1581_v54  ;;  %988 = vmatpush.msrb.mxu3 %v898_v0  ;;  %v881_v1 = vld [vmem:[#allocation2 + $0x20] sm:$0xff] }
  0xb4   : > { %v485_v5 = vmax.f32 %v374_v2, 0.0  ;;  %924 = vmatpush.msrb.mxu2 %v881_v1 }
  0xb5   : > { %v486_v6 = vmax.f32 %v439_v3, 0.0 }
  0xb6   : > { %604 = vmatmul.f32.gmra.mxu2 %v485_v5  ;;  %734 = vmatmul.f32.gmra.mxu0 %v485_v5 }
  0xb7   : > { %669 = vmatmul.f32.gmra.mxu3 %v486_v6  ;;  %799 = vmatmul.f32.gmra.mxu1 %v486_v6 }
  0xb9   : > { %v376_v8 = vpop.f32.mrf.mxu0 }
  0xba   : > { %v441_v9 = vpop.f32.mrf.mxu1  ;;  %v377_v10 = vadd.f32 %v376_v8, %v1579_v53  ;;  %v897_v8 = vld [vmem:[#allocation2 + $0xa0] sm:$0xff] }
  0xbb   : > { %v442_v11 = vadd.f32 %v441_v9, %v1581_v54  ;;  %989 = vmatpush.msrb.mxu3 %v897_v8  ;;  %v880_v9 = vld [vmem:[#allocation2 + $0x18] sm:$0xff] }
  0xbc   : > { %v487_v13 = vmax.f32 %v377_v10, 0.0  ;;  %925 = vmatpush.msrb.mxu2 %v880_v9 }
  0xbd   : > { %v488_v14 = vmax.f32 %v442_v11, 0.0 }
  0xbe   : > { %607 = vmatmul.f32.gmra.mxu2 %v487_v13  ;;  %737 = vmatmul.f32.gmra.mxu0 %v487_v13 }
  0xbf   : > { %672 = vmatmul.f32.gmra.mxu3 %v488_v14  ;;  %802 = vmatmul.f32.gmra.mxu1 %v488_v14 }
  0xc1   : > { %v379_v16 = vpop.f32.mrf.mxu0 }
  0xc2   : > { %v444_v17 = vpop.f32.mrf.mxu1  ;;  %v380_v18 = vadd.f32 %v379_v16, %v1579_v53  ;;  %v896_v16 = vld [vmem:[#allocation2 + $0x98] sm:$0xff] }
  0xc3   : > { %v445_v19 = vadd.f32 %v444_v17, %v1581_v54  ;;  %990 = vmatpush.msrb.mxu3 %v896_v16  ;;  %v879_v17 = vld [vmem:[#allocation2 + $0x10] sm:$0xff] }
  0xc4   : > { %v489_v21 = vmax.f32 %v380_v18, 0.0  ;;  %926 = vmatpush.msrb.mxu2 %v879_v17 }
  0xc5   : > { %v490_v22 = vmax.f32 %v445_v19, 0.0 }
  0xc6   : > { %610 = vmatmul.f32.gmra.mxu2 %v489_v21  ;;  %740 = vmatmul.f32.gmra.mxu0 %v489_v21 }
  0xc7   : > { %675 = vmatmul.f32.gmra.mxu3 %v490_v22  ;;  %805 = vmatmul.f32.gmra.mxu1 %v490_v22 }
  0xc9   : > { %v382_v24 = vpop.f32.mrf.mxu0 }
  0xca   : > { %v447_v25 = vpop.f32.mrf.mxu1  ;;  %v383_v26 = vadd.f32 %v382_v24, %v1579_v53  ;;  %v895_v24 = vld [vmem:[#allocation2 + $0x90] sm:$0xff] }
  0xcb   : > { %v448_v27 = vadd.f32 %v447_v25, %v1581_v54  ;;  %991 = vmatpush.msrb.mxu3 %v895_v24  ;;  %v878_v25 = vld [vmem:[#allocation2 + $0x8] sm:$0xff] }
  0xcc   : > { %v491_v28 = vmax.f32 %v383_v26, 0.0  ;;  %v894_v26 = vld [vmem:[#allocation2 + $0x88] sm:$0xff]  ;;  %927 = vmatpush.msrb.mxu2 %v878_v25 }
  0xcd   : > { %v492_v29 = vmax.f32 %v448_v27, 0.0  ;;  %992 = vmatpush.msrb.mxu3 %v894_v26 }
  0xce   : > { %613 = vmatmul.f32.gmra.mxu2 %v491_v28  ;;  %743 = vmatmul.f32.gmra.mxu0 %v491_v28 }
  0xcf   : > { %678 = vmatmul.f32.gmra.mxu3 %v492_v29  ;;  %808 = vmatmul.f32.gmra.mxu1 %v492_v29 }
  0xd1   : > { %v385_v32 = vpop.f32.mrf.mxu0 }
  0xd2   : > { %v450_v33 = vpop.f32.mrf.mxu1  ;;  %v386_v34 = vadd.f32 %v385_v32, %v1579_v53 }
  0xd3   : > { %v451_v35 = vadd.f32 %v450_v33, %v1581_v54  ;;  %v877_v33 = vld [vmem:[#allocation2] sm:$0xff] }
  0xd4   : > { %v493_v36 = vmax.f32 %v386_v34, 0.0  ;;  %v893_v34 = vld [vmem:[#allocation2 + $0x80] sm:$0xff]  ;;  %928 = vmatpush.msrb.mxu2 %v877_v33 }
  0xd5   : > { %v494_v37 = vmax.f32 %v451_v35, 0.0  ;;  %993 = vmatpush.msrb.mxu3 %v893_v34 }
  0xd6   : > { %616 = vmatmul.f32.gmra.mxu2 %v493_v36  ;;  %746 = vmatmul.f32.gmra.mxu0 %v493_v36 }
  0xd7   : > { %681 = vmatmul.f32.gmra.mxu3 %v494_v37  ;;  %811 = vmatmul.f32.gmra.mxu1 %v494_v37 }
  0xd9   : > { %v388_v40 = vpop.f32.mrf.mxu0 }
  0xda   : > { %v453_v41 = vpop.f32.mrf.mxu1  ;;  %v389_v42 = vadd.f32 %v388_v40, %v1579_v53 }
  0xdb   : > { %v454_v43 = vadd.f32 %v453_v41, %v1581_v54 }
  0xdc   : > { %v495_v44 = vmax.f32 %v389_v42, 0.0 }
  0xdd   : > { %v496_v45 = vmax.f32 %v454_v43, 0.0 }
  0xde   : > { %619 = vmatmul.f32.gmra.mxu2 %v495_v44  ;;  %749 = vmatmul.f32.gmra.mxu0 %v495_v44 }
  0xdf   : > { %684 = vmatmul.f32.gmra.mxu3 %v496_v45  ;;  %814 = vmatmul.f32.gmra.mxu1 %v496_v45 }
  0xe1   : > { %v391_v48 = vpop.f32.mrf.mxu0 }
  0xe2   : > { %v456_v49 = vpop.f32.mrf.mxu1  ;;  %v392_v50 = vadd.f32 %v391_v48, %v1579_v53 }
  0xe3   : > { %v457_v51 = vadd.f32 %v456_v49, %v1581_v54 }
  0xe4   : > { %v497_v52 = vmax.f32 %v392_v50, 0.0 }
  0xe5   : > { %v498_v55 = vmax.f32 %v457_v51, 0.0 }
  0xe6   : > { %622 = vmatmul.f32.gmra.mxu2 %v497_v52  ;;  %752 = vmatmul.f32.gmra.mxu0 %v497_v52 }
  0xe7   : > { %687 = vmatmul.f32.gmra.mxu3 %v498_v55  ;;  %817 = vmatmul.f32.gmra.mxu1 %v498_v55  ;;  %v579_v55 = vld [vmem:[%s1705_s4] sm:$0x3] }
  0xe8   : > { %v1618_v56 = vperm.slane %v579_v55, 1 }
  0xe9   : > { %v394_v58 = vpop.f32.mrf.mxu0 }
  0xea   : > { %v459_v59 = vpop.f32.mrf.mxu1  ;;  %v395_v60 = vadd.f32 %v394_v58, %v1579_v53 }
  0xeb   : > { %v460_v61 = vadd.f32 %v459_v59, %v1581_v54 }
  0xec   : > { %v499_v62 = vmax.f32 %v395_v60, 0.0 }
  0xed   : > { %v500_v63 = vmax.f32 %v460_v61, 0.0 }
  0xee   : > { %625 = vmatmul.f32.gmra.mxu2 %v499_v62  ;;  %755 = vmatmul.f32.gmra.mxu0 %v499_v62 }
  0xef   : > { %690 = vmatmul.f32.gmra.mxu3 %v500_v63  ;;  %820 = vmatmul.f32.gmra.mxu1 %v500_v63 }
  0xf1   : > { %v397_v2 = vpop.f32.mrf.mxu0 }
  0xf2   : > { %v462_v3 = vpop.f32.mrf.mxu1  ;;  %v398_v4 = vadd.f32 %v397_v2, %v1579_v53 }
  0xf3   : > { %v463_v5 = vadd.f32 %v462_v3, %v1581_v54 }
  0xf4   : > { %v501_v6 = vmax.f32 %v398_v4, 0.0 }
  0xf5   : > { %v502_v7 = vmax.f32 %v463_v5, 0.0 }
  0xf6   : > { %628 = vmatmul.f32.gmra.mxu2 %v501_v6  ;;  %758 = vmatmul.f32.gmra.mxu0 %v501_v6 }
  0xf7   : > { %693 = vmatmul.f32.gmra.mxu3 %v502_v7  ;;  %823 = vmatmul.f32.gmra.mxu1 %v502_v7 }
  0xf9   : > { %v400_v10 = vpop.f32.mrf.mxu0 }
  0xfa   : > { %v465_v11 = vpop.f32.mrf.mxu1  ;;  %v401_v12 = vadd.f32 %v400_v10, %v1579_v53 }
  0xfb   : > { %v466_v13 = vadd.f32 %v465_v11, %v1581_v54 }
  0xfc   : > { %v503_v14 = vmax.f32 %v401_v12, 0.0 }
  0xfd   : > { %v504_v15 = vmax.f32 %v466_v13, 0.0 }
  0xfe   : > { %631 = vmatmul.f32.gmra.mxu2 %v503_v14  ;;  %761 = vmatmul.f32.gmra.mxu0 %v503_v14 }
  0xff   : > { %696 = vmatmul.f32.gmra.mxu3 %v504_v15  ;;  %826 = vmatmul.f32.gmra.mxu1 %v504_v15 }
 0x101   : > { %v403_v18 = vpop.f32.mrf.mxu0 }
 0x102   : > { %v468_v19 = vpop.f32.mrf.mxu1  ;;  %v404_v20 = vadd.f32 %v403_v18, %v1579_v53 }
 0x103   : > { %v469_v21 = vadd.f32 %v468_v19, %v1581_v54 }
 0x104   : > { %v505_v22 = vmax.f32 %v404_v20, 0.0 }
 0x105   : > { %v506_v23 = vmax.f32 %v469_v21, 0.0 }
 0x106   : > { %634 = vmatmul.f32.gmra.mxu2 %v505_v22  ;;  %764 = vmatmul.f32.gmra.mxu0 %v505_v22 }
 0x107   : > { %699 = vmatmul.f32.gmra.mxu3 %v506_v23  ;;  %829 = vmatmul.f32.gmra.mxu1 %v506_v23 }
 0x109   : > { %v406_v27 = vpop.f32.mrf.mxu0 }
 0x10a   : > { %v471_v28 = vpop.f32.mrf.mxu1  ;;  %v407_v29 = vadd.f32 %v406_v27, %v1579_v53 }
 0x10b   : > { %v472_v30 = vadd.f32 %v471_v28, %v1581_v54 }
 0x10c   : > { %v507_v31 = vmax.f32 %v407_v29, 0.0 }
 0x10d   : > { %v508_v32 = vmax.f32 %v472_v30, 0.0 }
 0x10e   : > { %637 = vmatmul.f32.gmra.mxu2 %v507_v31  ;;  %767 = vmatmul.f32.gmra.mxu0 %v507_v31 }
 0x10f   : > { %702 = vmatmul.f32.gmra.mxu3 %v508_v32  ;;  %832 = vmatmul.f32.gmra.mxu1 %v508_v32 }
 0x111   : > { %v409_v35 = vpop.f32.mrf.mxu0 }
 0x112   : > { %v474_v36 = vpop.f32.mrf.mxu1  ;;  %v410_v37 = vadd.f32 %v409_v35, %v1579_v53 }
 0x113   : > { %v475_v38 = vadd.f32 %v474_v36, %v1581_v54 }
 0x114   : > { %v509_v39 = vmax.f32 %v410_v37, 0.0 }
 0x115   : > { %v510_v40 = vmax.f32 %v475_v38, 0.0 }
 0x116   : > { %640 = vmatmul.f32.gmra.mxu2 %v509_v39  ;;  %770 = vmatmul.f32.gmra.mxu0 %v509_v39 }
 0x117   : > { %705 = vmatmul.f32.gmra.mxu3 %v510_v40  ;;  %835 = vmatmul.f32.gmra.mxu1 %v510_v40 }
 0x119   : > { %v412_v41 = vpop.f32.mrf.mxu0 }
 0x11a   : > { %v477_v42 = vpop.f32.mrf.mxu1  ;;  %v413_v43 = vadd.f32 %v412_v41, %v1579_v53 }
 0x11b   : > { %v478_v44 = vadd.f32 %v477_v42, %v1581_v54 }
 0x11c   : > { %v511_v45 = vmax.f32 %v413_v43, 0.0 }
 0x11d   : > { %v512_v46 = vmax.f32 %v478_v44, 0.0 }
 0x11e   : > { %643 = vmatmul.f32.gmra.mxu2 %v511_v45  ;;  %773 = vmatmul.f32.gmra.mxu0 %v511_v45 }
 0x11f   : > { %708 = vmatmul.f32.gmra.mxu3 %v512_v46  ;;  %838 = vmatmul.f32.gmra.mxu1 %v512_v46 }
 0x121   : > { %v415_v47 = vpop.f32.mrf.mxu0 }
 0x122   : > { %v480_v48 = vpop.f32.mrf.mxu1  ;;  %v416_v49 = vadd.f32 %v415_v47, %v1579_v53  ;;  %v1621_v53 = vperm.slane %v579_v55, 0 }
 0x123   : > { %v481_v50 = vadd.f32 %v480_v48, %v1581_v54 }
 0x124   : > { %v513_v51 = vmax.f32 %v416_v49, 0.0 }
 0x125   : > { %v514_v52 = vmax.f32 %v481_v50, 0.0 }
 0x126   : > { %646 = vmatmul.f32.gmra.mxu2 %v513_v51  ;;  %776 = vmatmul.f32.gmra.mxu0 %v513_v51 }
 0x127   : > { %711 = vmatmul.f32.gmra.mxu3 %v514_v52  ;;  %841 = vmatmul.f32.gmra.mxu1 %v514_v52 }
 0x12b   : > { %v732_v57 = vpop.f32.mrf.mxu0 }
 0x12c   : > { %v733_v58 = vadd.f32 %v732_v57, %v1618_v56  ;;  %v797_v59 = vpop.f32.mrf.mxu1 }
 0x12e   : > { %v798_v60 = vadd.f32 %v797_v59, %v733_v58 }
 0x130   : > { %v846_v54 = vmax.f32 %v798_v60, 0.0 }
 0x131   : > { %v602_v61 = vpop.f32.mrf.mxu2 }
 0x132   : > { %v603_v62 = vadd.f32 %v602_v61, %v1621_v53  ;;  %994 = vmatmul.f32.vlgmr.msrb.gmra.mxu3 %v846_v54  ;;  %v667_v63 = vpop.f32.mrf.mxu3 }
 0x133   : > { %v735_v0 = vpop.f32.mrf.mxu0 }
 0x134   : > { %v668_v1 = vadd.f32 %v667_v63, %v603_v62  ;;  %v736_v2 = vadd.f32 %v735_v0, %v1618_v56  ;;  %v800_v3 = vpop.f32.mrf.mxu1 }
 0x136   : > { %v845_v4 = vmax.f32 %v668_v1, 0.0  ;;  %v801_v5 = vadd.f32 %v800_v3, %v736_v2 }
 0x138   : > { %v848_v6 = vmax.f32 %v801_v5, 0.0  ;;  %929 = vmatmul.f32.vlgmr.msrb.gmra.mxu2 %v845_v4 }
 0x139   : > { %v605_v7 = vpop.f32.mrf.mxu2 }
 0x13a   : > { %v606_v8 = vadd.f32 %v605_v7, %v1621_v53  ;;  %997 = vmatmul.f32.gmra.mxu3 %v848_v6  ;;  %v670_v9 = vpop.f32.mrf.mxu3 }
 0x13b   : > { %v738_v10 = vpop.f32.mrf.mxu0 }
 0x13c   : > { %v671_v11 = vadd.f32 %v670_v9, %v606_v8  ;;  %v739_v12 = vadd.f32 %v738_v10, %v1618_v56  ;;  %v803_v13 = vpop.f32.mrf.mxu1 }
 0x13e   : > { %v804_v14 = vadd.f32 %v803_v13, %v739_v12  ;;  %v847_v15 = vmax.f32 %v671_v11, 0.0 }
 0x140   : > { %v850_v16 = vmax.f32 %v804_v14, 0.0  ;;  %932 = vmatmul.f32.gmra.mxu2 %v847_v15 }
 0x141   : > { %v608_v17 = vpop.f32.mrf.mxu2 }
 0x142   : > { %v609_v18 = vadd.f32 %v608_v17, %v1621_v53  ;;  %1000 = vmatmul.f32.gmra.mxu3 %v850_v16  ;;  %v673_v19 = vpop.f32.mrf.mxu3 }
 0x143   : > { %v741_v20 = vpop.f32.mrf.mxu0 }
 0x144   : > { %v674_v21 = vadd.f32 %v673_v19, %v609_v18  ;;  %v742_v22 = vadd.f32 %v741_v20, %v1618_v56  ;;  %v806_v23 = vpop.f32.mrf.mxu1 }
 0x146   : > { %v807_v24 = vadd.f32 %v806_v23, %v742_v22  ;;  %v849_v25 = vmax.f32 %v674_v21, 0.0 }
 0x148   : > { %v852_v26 = vmax.f32 %v807_v24, 0.0  ;;  %935 = vmatmul.f32.gmra.mxu2 %v849_v25 }
 0x149   : > { %v611_v27 = vpop.f32.mrf.mxu2 }
 0x14a   : > { %v612_v28 = vadd.f32 %v611_v27, %v1621_v53  ;;  %1003 = vmatmul.f32.gmra.mxu3 %v852_v26  ;;  %v676_v29 = vpop.f32.mrf.mxu3 }
 0x14b   : > { %v744_v30 = vpop.f32.mrf.mxu0 }
 0x14c   : > { %v677_v31 = vadd.f32 %v676_v29, %v612_v28  ;;  %v745_v32 = vadd.f32 %v744_v30, %v1618_v56  ;;  %v809_v33 = vpop.f32.mrf.mxu1 }
 0x14e   : > { %v810_v34 = vadd.f32 %v809_v33, %v745_v32  ;;  %v851_v35 = vmax.f32 %v677_v31, 0.0 }
 0x150   : > { %v854_v36 = vmax.f32 %v810_v34, 0.0  ;;  %938 = vmatmul.f32.gmra.mxu2 %v851_v35 }
 0x151   : > { %v614_v37 = vpop.f32.mrf.mxu2 }
 0x152   : > { %v615_v38 = vadd.f32 %v614_v37, %v1621_v53  ;;  %1006 = vmatmul.f32.gmra.mxu3 %v854_v36  ;;  %v679_v39 = vpop.f32.mrf.mxu3 }
 0x153   : > { %v747_v40 = vpop.f32.mrf.mxu0 }
 0x154   : > { %v680_v41 = vadd.f32 %v679_v39, %v615_v38  ;;  %v748_v42 = vadd.f32 %v747_v40, %v1618_v56  ;;  %v812_v43 = vpop.f32.mrf.mxu1 }
 0x156   : > { %v813_v44 = vadd.f32 %v812_v43, %v748_v42  ;;  %v853_v45 = vmax.f32 %v680_v41, 0.0 }
 0x158   : > { %v856_v46 = vmax.f32 %v813_v44, 0.0  ;;  %941 = vmatmul.f32.gmra.mxu2 %v853_v45 }
 0x159   : > { %v617_v47 = vpop.f32.mrf.mxu2 }
 0x15a   : > { %v618_v48 = vadd.f32 %v617_v47, %v1621_v53  ;;  %1009 = vmatmul.f32.gmra.mxu3 %v856_v46  ;;  %v682_v49 = vpop.f32.mrf.mxu3 }
 0x15b   : > { %v750_v50 = vpop.f32.mrf.mxu0 }
 0x15c   : > { %v683_v51 = vadd.f32 %v682_v49, %v618_v48  ;;  %v751_v52 = vadd.f32 %v750_v50, %v1618_v56  ;;  %v815_v55 = vpop.f32.mrf.mxu1 }
 0x15e   : > { %v816_v57 = vadd.f32 %v815_v55, %v751_v52  ;;  %v855_v58 = vmax.f32 %v683_v51, 0.0 }
 0x160   : > { %v858_v59 = vmax.f32 %v816_v57, 0.0  ;;  %944 = vmatmul.f32.gmra.mxu2 %v855_v58 }
 0x161   : > { %v620_v60 = vpop.f32.mrf.mxu2 }
 0x162   : > { %v621_v54 = vadd.f32 %v620_v60, %v1621_v53  ;;  %1012 = vmatmul.f32.gmra.mxu3 %v858_v59  ;;  %v685_v61 = vpop.f32.mrf.mxu3 }
 0x163   : > { %v753_v62 = vpop.f32.mrf.mxu0 }
 0x164   : > { %v686_v63 = vadd.f32 %v685_v61, %v621_v54  ;;  %v754_v0 = vadd.f32 %v753_v62, %v1618_v56  ;;  %v818_v1 = vpop.f32.mrf.mxu1 }
 0x166   : > { %v819_v2 = vadd.f32 %v818_v1, %v754_v0  ;;  %v857_v3 = vmax.f32 %v686_v63, 0.0 }
 0x168   : > { %v860_v4 = vmax.f32 %v819_v2, 0.0  ;;  %947 = vmatmul.f32.gmra.mxu2 %v857_v3 }
 0x169   : > { %v623_v5 = vpop.f32.mrf.mxu2 }
 0x16a   : > { %v624_v6 = vadd.f32 %v623_v5, %v1621_v53  ;;  %1015 = vmatmul.f32.gmra.mxu3 %v860_v4  ;;  %v688_v7 = vpop.f32.mrf.mxu3 }
 0x16b   : > { %v756_v8 = vpop.f32.mrf.mxu0 }
 0x16c   : > { %v689_v9 = vadd.f32 %v688_v7, %v624_v6  ;;  %v757_v10 = vadd.f32 %v756_v8, %v1618_v56  ;;  %v821_v11 = vpop.f32.mrf.mxu1 }
 0x16e   : > { %v822_v12 = vadd.f32 %v821_v11, %v757_v10  ;;  %v859_v13 = vmax.f32 %v689_v9, 0.0 }
 0x170   : > { %v862_v14 = vmax.f32 %v822_v12, 0.0  ;;  %950 = vmatmul.f32.gmra.mxu2 %v859_v13 }
 0x171   : > { %v626_v15 = vpop.f32.mrf.mxu2 }
 0x172   : > { %v627_v16 = vadd.f32 %v626_v15, %v1621_v53  ;;  %1018 = vmatmul.f32.gmra.mxu3 %v862_v14  ;;  %v691_v17 = vpop.f32.mrf.mxu3 }
 0x173   : > { %v759_v18 = vpop.f32.mrf.mxu0 }
 0x174   : > { %v692_v19 = vadd.f32 %v691_v17, %v627_v16  ;;  %v760_v20 = vadd.f32 %v759_v18, %v1618_v56  ;;  %v824_v21 = vpop.f32.mrf.mxu1 }
 0x176   : > { %v861_v22 = vmax.f32 %v692_v19, 0.0  ;;  %v825_v23 = vadd.f32 %v824_v21, %v760_v20 }
 0x178   : > { %v864_v24 = vmax.f32 %v825_v23, 0.0  ;;  %953 = vmatmul.f32.gmra.mxu2 %v861_v22 }
 0x179   : > { %v629_v25 = vpop.f32.mrf.mxu2 }
 0x17a   : > { %v630_v26 = vadd.f32 %v629_v25, %v1621_v53  ;;  %1021 = vmatmul.f32.gmra.mxu3 %v864_v24  ;;  %v694_v27 = vpop.f32.mrf.mxu3 }
 0x17b   : > { %v762_v28 = vpop.f32.mrf.mxu0 }
 0x17c   : > { %v695_v29 = vadd.f32 %v694_v27, %v630_v26  ;;  %v763_v30 = vadd.f32 %v762_v28, %v1618_v56  ;;  %v827_v31 = vpop.f32.mrf.mxu1 }
 0x17e   : > { %v863_v32 = vmax.f32 %v695_v29, 0.0  ;;  %v828_v33 = vadd.f32 %v827_v31, %v763_v30  ;;  %v1657_v29 = vld [vmem:[%s1707_s6] ss:$0 sm:$0xff] }
 0x180   : > { %v866_v34 = vmax.f32 %v828_v33, 0.0  ;;  %956 = vmatmul.f32.gmra.mxu2 %v863_v32 }
 0x181   : > { %v632_v35 = vpop.f32.mrf.mxu2 }
 0x182   : > { %v633_v36 = vadd.f32 %v632_v35, %v1621_v53  ;;  %1024 = vmatmul.f32.gmra.mxu3 %v866_v34  ;;  %v697_v37 = vpop.f32.mrf.mxu3 }
 0x183   : > { %v765_v38 = vpop.f32.mrf.mxu0 }
 0x184   : > { %v698_v39 = vadd.f32 %v697_v37, %v633_v36  ;;  %v766_v40 = vadd.f32 %v765_v38, %v1618_v56  ;;  %v830_v41 = vpop.f32.mrf.mxu1 }
 0x186   : > { %v865_v42 = vmax.f32 %v698_v39, 0.0  ;;  %v831_v43 = vadd.f32 %v830_v41, %v766_v40 }
 0x188   : > { %v868_v44 = vmax.f32 %v831_v43, 0.0  ;;  %959 = vmatmul.f32.gmra.mxu2 %v865_v42 }
 0x189   : > { %v635_v45 = vpop.f32.mrf.mxu2 }
 0x18a   : > { %v636_v46 = vadd.f32 %v635_v45, %v1621_v53  ;;  %1027 = vmatmul.f32.gmra.mxu3 %v868_v44  ;;  %v700_v47 = vpop.f32.mrf.mxu3 }
 0x18b   : > { %v768_v48 = vpop.f32.mrf.mxu0 }
 0x18c   : > { %v701_v49 = vadd.f32 %v700_v47, %v636_v46  ;;  %v769_v50 = vadd.f32 %v768_v48, %v1618_v56  ;;  %v833_v51 = vpop.f32.mrf.mxu1 }
 0x18e   : > { %v867_v52 = vmax.f32 %v701_v49, 0.0  ;;  %v834_v55 = vadd.f32 %v833_v51, %v769_v50 }
 0x190   : > { %v870_v57 = vmax.f32 %v834_v55, 0.0  ;;  %962 = vmatmul.f32.gmra.mxu2 %v867_v52 }
 0x191   : > { %v638_v58 = vpop.f32.mrf.mxu2 }
 0x192   : > { %v639_v59 = vadd.f32 %v638_v58, %v1621_v53  ;;  %1030 = vmatmul.f32.gmra.mxu3 %v870_v57  ;;  %v703_v60 = vpop.f32.mrf.mxu3 }
 0x193   : > { %v771_v54 = vpop.f32.mrf.mxu0 }
 0x194   : > { %v704_v61 = vadd.f32 %v703_v60, %v639_v59  ;;  %v772_v62 = vadd.f32 %v771_v54, %v1618_v56  ;;  %v836_v63 = vpop.f32.mrf.mxu1 }
 0x196   : > { %v869_v0 = vmax.f32 %v704_v61, 0.0  ;;  %v837_v1 = vadd.f32 %v836_v63, %v772_v62 }
 0x198   : > { %v872_v2 = vmax.f32 %v837_v1, 0.0  ;;  %965 = vmatmul.f32.gmra.mxu2 %v869_v0 }
 0x199   : > { %v641_v3 = vpop.f32.mrf.mxu2 }
 0x19a   : > { %v642_v4 = vadd.f32 %v641_v3, %v1621_v53  ;;  %1033 = vmatmul.f32.gmra.mxu3 %v872_v2  ;;  %v706_v5 = vpop.f32.mrf.mxu3 }
 0x19b   : > { %v774_v6 = vpop.f32.mrf.mxu0 }
 0x19c   : > { %v707_v7 = vadd.f32 %v706_v5, %v642_v4  ;;  %v775_v8 = vadd.f32 %v774_v6, %v1618_v56  ;;  %v839_v9 = vpop.f32.mrf.mxu1 }
 0x19e   : > { %v871_v10 = vmax.f32 %v707_v7, 0.0  ;;  %v840_v11 = vadd.f32 %v839_v9, %v775_v8 }
 0x1a0   : > { %v874_v12 = vmax.f32 %v840_v11, 0.0  ;;  %968 = vmatmul.f32.gmra.mxu2 %v871_v10 }
 0x1a1   : > { %v644_v13 = vpop.f32.mrf.mxu2 }
 0x1a2   : > { %v645_v14 = vadd.f32 %v644_v13, %v1621_v53  ;;  %1036 = vmatmul.f32.gmra.mxu3 %v874_v12  ;;  %v709_v15 = vpop.f32.mrf.mxu3 }
 0x1a3   : > { %v777_v16 = vpop.f32.mrf.mxu0 }
 0x1a4   : > { %v710_v17 = vadd.f32 %v709_v15, %v645_v14  ;;  %v778_v18 = vadd.f32 %v777_v16, %v1618_v56  ;;  %v842_v19 = vpop.f32.mrf.mxu1 }
 0x1a6   : > { %v873_v20 = vmax.f32 %v710_v17, 0.0  ;;  %v843_v21 = vadd.f32 %v842_v19, %v778_v18 }
 0x1a8   : > { %v876_v22 = vmax.f32 %v843_v21, 0.0  ;;  %971 = vmatmul.f32.gmra.mxu2 %v873_v20 }
 0x1a9   : > { %v647_v23 = vpop.f32.mrf.mxu2 }
 0x1aa   : > { %v648_v24 = vadd.f32 %v647_v23, %v1621_v53  ;;  %1039 = vmatmul.f32.gmra.mxu3 %v876_v22  ;;  %v712_v25 = vpop.f32.mrf.mxu3 }
 0x1ac   : > { %v713_v26 = vadd.f32 %v712_v25, %v648_v24 }
 0x1ae   : > { %v875_v27 = vmax.f32 %v713_v26, 0.0 }
 0x1b0   : > { %974 = vmatmul.f32.gmra.mxu2 %v875_v27 }
 0x1b5   : > { %v995_v28 = vpop.f32.mrf.mxu3 }
 0x1bb   : > { %v930_v56 = vpop.f32.mrf.mxu2 }
 0x1bc   : > { %v931_v30 = vadd.f32 %v1657_v29, %v930_v56 }
 0x1bd   : > { %v998_v53 = vpop.f32.mrf.mxu3 }
 0x1be   : > { %v996_v31 = vadd.f32 %v995_v28, %v931_v30 }
 0x1c0   : > { %1043 = vst [vmem:[%s1665_s17] sm:$0xff] %v996_v31 }
 0x1c3   : > { %v933_v32 = vpop.f32.mrf.mxu2 }
 0x1c4   : > { %v934_v33 = vadd.f32 %v1657_v29, %v933_v32 }
 0x1c5   : > { %v1001_v34 = vpop.f32.mrf.mxu3 }
 0x1c6   : > { %v999_v35 = vadd.f32 %v998_v53, %v934_v33 }
 0x1c8   : > { %1044 = vst [vmem:[%s1665_s17 + $0x8] sm:$0xff] %v999_v35 }
 0x1cb   : > { %v936_v36 = vpop.f32.mrf.mxu2 }
 0x1cc   : > { %v937_v37 = vadd.f32 %v1657_v29, %v936_v36 }
 0x1cd   : > { %v1004_v38 = vpop.f32.mrf.mxu3 }
 0x1ce   : > { %v1002_v39 = vadd.f32 %v1001_v34, %v937_v37 }
 0x1d0   : > { %1045 = vst [vmem:[%s1665_s17 + $0x10] sm:$0xff] %v1002_v39 }
 0x1d3   : > { %v939_v40 = vpop.f32.mrf.mxu2 }
 0x1d4   : > { %v940_v41 = vadd.f32 %v1657_v29, %v939_v40 }
 0x1d5   : > { %v1007_v42 = vpop.f32.mrf.mxu3 }
 0x1d6   : > { %v1005_v43 = vadd.f32 %v1004_v38, %v940_v41 }
 0x1d8   : > { %1046 = vst [vmem:[%s1665_s17 + $0x18] sm:$0xff] %v1005_v43 }
 0x1db   : > { %v942_v44 = vpop.f32.mrf.mxu2 }
 0x1dc   : > { %v943_v45 = vadd.f32 %v1657_v29, %v942_v44 }
 0x1dd   : > { %v1010_v46 = vpop.f32.mrf.mxu3 }
 0x1de   : > { %v1008_v47 = vadd.f32 %v1007_v42, %v943_v45 }
 0x1e0   : > { %1047 = vst [vmem:[%s1665_s17 + $0x20] sm:$0xff] %v1008_v47 }
 0x1e3   : > { %v945_v48 = vpop.f32.mrf.mxu2 }
 0x1e4   : > { %v946_v49 = vadd.f32 %v1657_v29, %v945_v48 }
 0x1e5   : > { %v1013_v50 = vpop.f32.mrf.mxu3 }
 0x1e6   : > { %v1011_v51 = vadd.f32 %v1010_v46, %v946_v49 }
 0x1e8   : > { %1048 = vst [vmem:[%s1665_s17 + $0x28] sm:$0xff] %v1011_v51 }
 0x1eb   : > { %v948_v52 = vpop.f32.mrf.mxu2 }
 0x1ec   : > { %v949_v55 = vadd.f32 %v1657_v29, %v948_v52 }
 0x1ed   : > { %v1016_v57 = vpop.f32.mrf.mxu3 }
 0x1ee   : > { %v1014_v58 = vadd.f32 %v1013_v50, %v949_v55 }
 0x1f0   : > { %1049 = vst [vmem:[%s1665_s17 + $0x30] sm:$0xff] %v1014_v58 }
 0x1f3   : > { %v951_v59 = vpop.f32.mrf.mxu2 }
 0x1f4   : > { %v952_v60 = vadd.f32 %v1657_v29, %v951_v59 }
 0x1f5   : > { %v1019_v54 = vpop.f32.mrf.mxu3 }
 0x1f6   : > { %v1017_v61 = vadd.f32 %v1016_v57, %v952_v60 }
 0x1f8   : > { %1050 = vst [vmem:[%s1665_s17 + $0x38] sm:$0xff] %v1017_v61 }
 0x1fb   : > { %v954_v62 = vpop.f32.mrf.mxu2 }
 0x1fc   : > { %v955_v63 = vadd.f32 %v1657_v29, %v954_v62 }
 0x1fd   : > { %v1022_v0 = vpop.f32.mrf.mxu3 }
 0x1fe   : > { %v1020_v1 = vadd.f32 %v1019_v54, %v955_v63 }
 0x200   : > { %1051 = vst [vmem:[%s1665_s17 + $0x40] sm:$0xff] %v1020_v1 }
 0x203   : > { %v957_v2 = vpop.f32.mrf.mxu2 }
 0x204   : > { %v958_v3 = vadd.f32 %v1657_v29, %v957_v2 }
 0x205   : > { %v1025_v4 = vpop.f32.mrf.mxu3 }
 0x206   : > { %v1023_v5 = vadd.f32 %v1022_v0, %v958_v3 }
 0x208   : > { %1052 = vst [vmem:[%s1665_s17 + $0x48] sm:$0xff] %v1023_v5 }
 0x20b   : > { %v960_v6 = vpop.f32.mrf.mxu2 }
 0x20c   : > { %v961_v7 = vadd.f32 %v1657_v29, %v960_v6 }
 0x20d   : > { %v1028_v8 = vpop.f32.mrf.mxu3 }
 0x20e   : > { %v1026_v9 = vadd.f32 %v1025_v4, %v961_v7 }
 0x210   : > { %1053 = vst [vmem:[%s1665_s17 + $0x50] sm:$0xff] %v1026_v9 }
 0x213   : > { %v963_v10 = vpop.f32.mrf.mxu2 }
 0x214   : > { %v964_v11 = vadd.f32 %v1657_v29, %v963_v10 }
 0x215   : > { %v1031_v13 = vpop.f32.mrf.mxu3 }
 0x216   : > { %v1029_v12 = vadd.f32 %v1028_v8, %v964_v11 }
 0x218   : > { %1054 = vst [vmem:[%s1665_s17 + $0x58] sm:$0xff] %v1029_v12 }
 0x21b   : > { %v966_v14 = vpop.f32.mrf.mxu2 }
 0x21c   : > { %v967_v15 = vadd.f32 %v1657_v29, %v966_v14 }
 0x21d   : > { %v1034_v17 = vpop.f32.mrf.mxu3 }
 0x21e   : > { %v1032_v16 = vadd.f32 %v1031_v13, %v967_v15 }
 0x220   : > { %1055 = vst [vmem:[%s1665_s17 + $0x60] sm:$0xff] %v1032_v16 }
 0x223   : > { %v969_v18 = vpop.f32.mrf.mxu2 }
 0x224   : > { %v970_v19 = vadd.f32 %v1657_v29, %v969_v18 }
 0x225   : > { %v1037_v21 = vpop.f32.mrf.mxu3 }
 0x226   : > { %v1035_v20 = vadd.f32 %v1034_v17, %v970_v19 }
 0x228   : > { %1056 = vst [vmem:[%s1665_s17 + $0x68] sm:$0xff] %v1035_v20 }
 0x22b   : > { %v972_v22 = vpop.f32.mrf.mxu2 }
 0x22c   : > { %v973_v23 = vadd.f32 %v1657_v29, %v972_v22 }
 0x22d   : > { %v1040_v27 = vpop.f32.mrf.mxu3 }
 0x22e   : > { %v1038_v24 = vadd.f32 %v1037_v21, %v973_v23 }
 0x230   : > { %1057 = vst [vmem:[%s1665_s17 + $0x70] sm:$0xff] %v1038_v24 }
 0x233   : > { %v975_v25 = vpop.f32.mrf.mxu2 }
 0x234   : > { %v976_v26 = vadd.f32 %v1657_v29, %v975_v25 }
 0x236   : > { %v1041_v28 = vadd.f32 %v1040_v27, %v976_v26 }
 0x238   : > { %1058 = vst [vmem:[%s1665_s17 + $0x78] sm:$0xff] %v1041_v28 }
 0x239 PF: > { %s18_s24 = sadd.s32 1, %s1202_s24  }
 0x23a   : > { %p15_p7 = scmp.ge.s32.totalorder %s18_s24, 4  }
 0x23c   :  { %17 = sbr.rel (!%p15_p7) target bundleno = 1 (0x1), region = 83 }
 0x241   :  { %1081 = vsyncpa [#allocation3], 1 }
 0x242   :  { %1083 = vsyncpa [#allocation3 + $0x1], 1 }

</bundles_post_ra>
